<compile_context>
chip_gen: v6e
topology: v6e:2x2x1
jax: 0.10.0
libtpu: 0.0.40
codegen_flags: <defaults>
</compile_context>

<pallas_src>
import jax
import jax.numpy as jnp
from jax.experimental import pallas as pl
from jax.experimental.pallas import tpu as pltpu


def _pack_offsets(C):
    """Static row offsets of each parameter section in the packed (R, C) buffer.

    Each section starts on an 8-row (sublane) boundary so every in-kernel
    slice is an aligned sublane window.
    """
    def rnd8(x):
        return (x + 7) // 8 * 8

    o_w1 = 0                       # (2C, C)  gate[0] weight, [in, out]
    o_b1 = rnd8(o_w1 + 2 * C)      # (1, C)   gate[0] bias
    o_w2 = rnd8(o_b1 + 1)          # (2, C)   gate[2] weight, [out, in]
    o_b2 = rnd8(o_w2 + 2)          # (1, C)   gate[2] bias in lanes 0:2, rest 0
    o_wp = rnd8(o_b2 + 1)          # (C, C)   fusion_proj weight, [in, out]
    o_bp = rnd8(o_wp + C)          # (1, C)   fusion_proj bias
    total = rnd8(o_bp + 1)
    return o_w1, o_b1, o_w2, o_b2, o_wp, o_bp, total


def _fusion_kernel(img_ref, clin_ref, params_ref, out_ref):
    # img_ref    : (B, L, C) f32
    # clin_ref   : (B, C)    f32
    # params_ref : (R, C)    f32 packed parameters (see _pack_offsets)
    # out_ref    : (B, L, C)
    B, L, C = img_ref.shape
    o_w1, o_b1, o_w2, o_b2, o_wp, o_bp, _ = _pack_offsets(C)

    img = img_ref[...]                         # (B, L, C)
    clin = clin_ref[...]                       # (B, C)

    wp = params_ref[o_wp:o_wp + C, :]          # (C, C) [in, out]
    bp = params_ref[o_bp:o_bp + 1, :]          # (1, C)

    # ---- hot path: projection, independent of the gate (MXU) ---------------
    # Distributed over the gate by linearity: fused @ Wp
    #   == w_img * (img @ Wp) + w_clin * (clin @ Wp).
    img2 = img.reshape(B * L, C)               # leading-dim merge (L % 8 == 0)
    proj_img = jnp.dot(img2, wp,
                       preferred_element_type=jnp.float32)          # (B*L, C)
    proj_clin = jnp.dot(clin, wp,
                        preferred_element_type=jnp.float32)         # (B, C)

    # ---- gate (cold path: hides under the MXU work above) ------------------
    # mean over L of concat([img, clin_expanded], -1) == [mean_L(img), clin],
    # so no lane-axis concat is needed (split-weight formulation below).
    img_mean = jnp.concatenate(
        [jnp.mean(img_ref[b], axis=0, keepdims=True) for b in range(B)],
        axis=0)                                                      # (B, C)

    w1_img = params_ref[o_w1:o_w1 + C, :]          # (C, C)  W1 rows for img half
    w1_clin = params_ref[o_w1 + C:o_w1 + 2 * C, :]  # (C, C)  W1 rows for clin half
    b1 = params_ref[o_b1:o_b1 + 1, :]              # (1, C)
    w2 = params_ref[o_w2:o_w2 + 2, :]              # (2, C)  [out, in]
    b2 = params_ref[o_b2:o_b2 + 1, :]              # (1, C)  (bias in lanes 0:2)

    hidden = (
        jnp.dot(img_mean, w1_img, preferred_element_type=jnp.float32)
        + jnp.dot(clin, w1_clin, preferred_element_type=jnp.float32)
        + b1
    )                                                                # (B, C)
    hidden = jnp.maximum(hidden, 0.0)

    # 2-wide logits on the VPU (multiply) + XLU (lane reduce); avoids an N=2
    # lane-sparse MXU matmul.
    logit_img = (jnp.sum(hidden * w2[0:1, :], axis=-1, keepdims=True)
                 + b2[:, 0:1])                                       # (B, 1)
    logit_clin = (jnp.sum(hidden * w2[1:2, :], axis=-1, keepdims=True)
                  + b2[:, 1:2])                                      # (B, 1)

    # Stable softmax over the pair (exact division keeps f32 reference parity).
    m = jnp.maximum(logit_img, logit_clin)
    e_img = jnp.exp(logit_img - m)
    e_clin = jnp.exp(logit_clin - m)
    denom = e_img + e_clin
    w_img = e_img / denom                                            # (B, 1)
    w_clin = e_clin / denom                                          # (B, 1)

    # ---- combine (VPU only) -------------------------------------------------
    proj_img3 = proj_img.reshape(B, L, C)
    out = (w_img[:, :, None] * proj_img3
           + (w_clin * proj_clin)[:, None, :]
           + bp)                                                     # (B, L, C)

    # TODO(synk): nn.Dropout is identity in eval mode; training-mode dropout
    # would need pltpu.prng_random_bits + masking here.
    out_ref[...] = out.astype(out_ref.dtype)


def pack_params(params, C):
    """Pack (w1, b1, w2, b2, wp, bp) into one (R, C) f32 buffer.

    Constant under jit — packing cost is paid once at trace/compile time or
    as a single cheap host-side op in eager mode.
    """
    w1, b1, w2, b2, wp, bp = params
    o_w1, o_b1, o_w2, o_b2, o_wp, o_bp, total = _pack_offsets(C)
    packed = jnp.zeros((total, C), jnp.float32)
    packed = packed.at[o_w1:o_w1 + 2 * C, :].set(w1)
    packed = packed.at[o_b1, :].set(b1[0])
    packed = packed.at[o_w2:o_w2 + 2, :].set(w2)
    packed = packed.at[o_b2, 0:2].set(b2[0])
    packed = packed.at[o_wp:o_wp + C, :].set(wp)
    packed = packed.at[o_bp, :].set(bp[0])
    return packed


def clinical_image_fusion(image_features, clinical_features, params):
    """image_features: [B, L, C] f32, clinical_features: [B, C] f32."""
    B, L, C = image_features.shape
    packed = pack_params(params, C)

    # Whole-problem single invocation: no grid, whole-array VMEM specs
    # (3 input DMAs total: img ~16 KB, clin ~0.25 KB, params ~16 KB).
    vmem = pltpu.MemorySpace.VMEM
    return pl.pallas_call(
        _fusion_kernel,
        out_shape=jax.ShapeDtypeStruct((B, L, C), image_features.dtype),
        in_specs=[
            pl.BlockSpec(memory_space=vmem),   # image features (B, L, C)
            pl.BlockSpec(memory_space=vmem),   # clinical features (B, C)
            pl.BlockSpec(memory_space=vmem),   # packed parameters (R, C)
        ],
        out_specs=pl.BlockSpec(memory_space=vmem),
    )(image_features, clinical_features, packed)


def init_params(key, C):
    """Deterministic params mirroring the PyTorch module's shapes.

    W1 and Wp are pre-transposed to [in, out] so the kernel computes x @ W;
    W2 is kept in PyTorch [out, in] layout (2, C) so its two rows feed the
    VPU logit reductions directly.
    """
    ks = jax.random.split(key, 6)

    def lin(kw, kb, fan_in, fan_out, transpose=True):
        bound = 1.0 / jnp.sqrt(float(fan_in))
        shape = (fan_in, fan_out) if transpose else (fan_out, fan_in)
        w = jax.random.uniform(kw, shape, jnp.float32, -bound, bound)
        b = jax.random.uniform(kb, (1, fan_out), jnp.float32, -bound, bound)
        return w, b

    w1, b1 = lin(ks[0], ks[1], 2 * C, C)                # gate[0]: Linear(2C, C)
    w2, b2 = lin(ks[2], ks[3], C, 2, transpose=False)   # gate[2]: Linear(C, 2)
    wp, bp = lin(ks[4], ks[5], C, C)                    # fusion_proj: Linear(C, C)
    return (w1, b1, w2, b2, wp, bp)


def reference_fusion(image_features, clinical_features, params):
    """Pure-JAX reference of the PyTorch forward (adaptive, eval mode)."""
    w1, b1, w2, b2, wp, bp = params
    B, L, C = image_features.shape
    clin_exp = jnp.broadcast_to(clinical_features[:, None, :], (B, L, C))
    combined = jnp.concatenate([image_features, clin_exp], axis=-1)   # [B, L, 2C]
    gate_in = combined.mean(axis=1)                                   # [B, 2C]
    hidden = jnp.maximum(gate_in @ w1 + b1, 0.0)                      # [B, C]
    logits = hidden @ w2.T + b2                                       # [B, 2]
    weights = jax.nn.softmax(logits, axis=1)
    w_img = weights[:, 0:1][:, :, None]
    w_clin = weights[:, 1:2][:, :, None]
    fused = w_img * image_features + w_clin * clin_exp
    return fused @ wp + bp


if __name__ == "__main__":
    B, L, C = 2, 64, 32   # image_dim == clinical_dim == C
    key = jax.random.PRNGKey(0)
    k_img, k_clin, k_par = jax.random.split(key, 3)

    image_features = jax.random.normal(k_img, (B, L, C), jnp.float32)
    clinical_features = jax.random.normal(k_clin, (B, C), jnp.float32)
    params = init_params(k_par, C)

    out = clinical_image_fusion(image_features, clinical_features, params)
    out = jax.block_until_ready(out)

    ref = reference_fusion(image_features, clinical_features, params)
    assert out.shape == (B, L, C)
    assert jnp.allclose(out, ref, atol=1e-4, rtol=1e-4), "mismatch vs reference"

    print("KERNEL_OK")
</pallas_src>

<mosaic_0001>
module attributes {stable_mosaic.version = 11 : i64} {
  func.func @_fusion_kernel(%arg0: memref<2x64x32xf32, #tpu.memory_space<vmem>>, %arg1: memref<2x32xf32, #tpu.memory_space<vmem>>, %arg2: memref<128x32xf32, #tpu.memory_space<vmem>>, %arg3: memref<2x64x32xf32, #tpu.memory_space<vmem>>) attributes {dimension_semantics = [], scalar_prefetch = 0 : i64, scratch_operands = 0 : i64, tpu.core_type = #tpu.core_type<tc>} {
    %c0 = arith.constant 0 : index
    %c0_0 = arith.constant 0 : index
    %c0_1 = arith.constant 0 : index
    %0 = vector.load %arg0[%c0, %c0_0, %c0_1] : memref<2x64x32xf32, #tpu.memory_space<vmem>>, vector<2x64x32xf32>
    %c0_2 = arith.constant 0 : index
    %c0_3 = arith.constant 0 : index
    %1 = vector.load %arg1[%c0_2, %c0_3] : memref<2x32xf32, #tpu.memory_space<vmem>>, vector<2x32xf32>
    %c88 = arith.constant 88 : index
    %c0_4 = arith.constant 0 : index
    %2 = vector.load %arg2[%c88, %c0_4] : memref<128x32xf32, #tpu.memory_space<vmem>>, vector<32x32xf32>
    %c120 = arith.constant 120 : index
    %c0_5 = arith.constant 0 : index
    %3 = vector.load %arg2[%c120, %c0_5] : memref<128x32xf32, #tpu.memory_space<vmem>>, vector<1x32xf32>
    %4 = vector.shape_cast %0 : vector<2x64x32xf32> to vector<128x32xf32>
    %cst = arith.constant dense<0.000000e+00> : vector<128x32xf32>
    %5 = tpu.matmul %4, %2, %cst {dimension_numbers = #tpu.dot_dimension_numbers<[1], [0], [0], [1], [0, 0, 1, 1], [], []>} : vector<128x32xf32>, vector<32x32xf32>, vector<128x32xf32> -> vector<128x32xf32>
    %cst_6 = arith.constant dense<0.000000e+00> : vector<2x32xf32>
    %6 = tpu.matmul %1, %2, %cst_6 {dimension_numbers = #tpu.dot_dimension_numbers<[1], [0], [0], [1], [0, 0, 1, 1], [], []>} : vector<2x32xf32>, vector<32x32xf32>, vector<2x32xf32> -> vector<2x32xf32>
    %c0_7 = arith.constant 0 : index
    %c0_8 = arith.constant 0 : index
    %c0_9 = arith.constant 0 : index
    %7 = vector.load %arg0[%c0_7, %c0_8, %c0_9] : memref<2x64x32xf32, #tpu.memory_space<vmem>>, vector<1x64x32xf32>
    %8 = vector.shape_cast %7 : vector<1x64x32xf32> to vector<64x32xf32>
    %cst_10 = arith.constant dense<0.000000e+00> : vector<32xf32>
    %9 = vector.multi_reduction <add>, %8, %cst_10 [0] : vector<64x32xf32> to vector<32xf32>
    %10 = vector.shape_cast %9 : vector<32xf32> to vector<1x32xf32>
    %cst_11 = arith.constant 6.400000e+01 : f32
    %11 = vector.broadcast %cst_11 : f32 to vector<1x32xf32>
    %12 = arith.divf %10, %11 : vector<1x32xf32>
    %c1 = arith.constant 1 : index
    %c0_12 = arith.constant 0 : index
    %c0_13 = arith.constant 0 : index
    %13 = vector.load %arg0[%c1, %c0_12, %c0_13] : memref<2x64x32xf32, #tpu.memory_space<vmem>>, vector<1x64x32xf32>
    %14 = vector.shape_cast %13 : vector<1x64x32xf32> to vector<64x32xf32>
    %cst_14 = arith.constant dense<0.000000e+00> : vector<32xf32>
    %15 = vector.multi_reduction <add>, %14, %cst_14 [0] : vector<64x32xf32> to vector<32xf32>
    %16 = vector.shape_cast %15 : vector<32xf32> to vector<1x32xf32>
    %cst_15 = arith.constant 6.400000e+01 : f32
    %17 = vector.broadcast %cst_15 : f32 to vector<1x32xf32>
    %18 = arith.divf %16, %17 : vector<1x32xf32>
    %19 = tpu.concatenate %12, %18 in 0 : vector<1x32xf32>, vector<1x32xf32> -> vector<2x32xf32>
    %c0_16 = arith.constant 0 : index
    %c0_17 = arith.constant 0 : index
    %20 = vector.load %arg2[%c0_16, %c0_17] : memref<128x32xf32, #tpu.memory_space<vmem>>, vector<32x32xf32>
    %c32 = arith.constant 32 : index
    %c0_18 = arith.constant 0 : index
    %21 = vector.load %arg2[%c32, %c0_18] : memref<128x32xf32, #tpu.memory_space<vmem>>, vector<32x32xf32>
    %c64 = arith.constant 64 : index
    %c0_19 = arith.constant 0 : index
    %22 = vector.load %arg2[%c64, %c0_19] : memref<128x32xf32, #tpu.memory_space<vmem>>, vector<1x32xf32>
    %c72 = arith.constant 72 : index
    %c0_20 = arith.constant 0 : index
    %23 = vector.load %arg2[%c72, %c0_20] : memref<128x32xf32, #tpu.memory_space<vmem>>, vector<2x32xf32>
    %c80 = arith.constant 80 : index
    %c0_21 = arith.constant 0 : index
    %24 = vector.load %arg2[%c80, %c0_21] : memref<128x32xf32, #tpu.memory_space<vmem>>, vector<1x32xf32>
    %cst_22 = arith.constant dense<0.000000e+00> : vector<2x32xf32>
    %25 = tpu.matmul %19, %20, %cst_22 {dimension_numbers = #tpu.dot_dimension_numbers<[1], [0], [0], [1], [0, 0, 1, 1], [], []>} : vector<2x32xf32>, vector<32x32xf32>, vector<2x32xf32> -> vector<2x32xf32>
    %cst_23 = arith.constant dense<0.000000e+00> : vector<2x32xf32>
    %26 = tpu.matmul %1, %21, %cst_23 {dimension_numbers = #tpu.dot_dimension_numbers<[1], [0], [0], [1], [0, 0, 1, 1], [], []>} : vector<2x32xf32>, vector<32x32xf32>, vector<2x32xf32> -> vector<2x32xf32>
    %27 = arith.addf %25, %26 : vector<2x32xf32>
    %28 = vector.broadcast %22 : vector<1x32xf32> to vector<2x32xf32>
    %29 = arith.addf %27, %28 : vector<2x32xf32>
    %cst_24 = arith.constant 0.000000e+00 : f32
    %30 = vector.broadcast %cst_24 : f32 to vector<2x32xf32>
    %31 = arith.maximumf %29, %30 : vector<2x32xf32>
    %32 = vector.extract_strided_slice %23 {offsets = [0, 0], sizes = [1, 32], strides = [1, 1]} : vector<2x32xf32> to vector<1x32xf32>
    %33 = vector.broadcast %32 : vector<1x32xf32> to vector<2x32xf32>
    %34 = arith.mulf %31, %33 : vector<2x32xf32>
    %cst_25 = arith.constant dense<0.000000e+00> : vector<2xf32>
    %35 = vector.multi_reduction <add>, %34, %cst_25 [1] : vector<2x32xf32> to vector<2xf32>
    %36 = vector.shape_cast %35 : vector<2xf32> to vector<2x1xf32>
    %37 = vector.extract_strided_slice %24 {offsets = [0, 0], sizes = [1, 1], strides = [1, 1]} : vector<1x32xf32> to vector<1x1xf32>
    %38 = vector.broadcast %37 : vector<1x1xf32> to vector<2x1xf32>
    %39 = arith.addf %36, %38 : vector<2x1xf32>
    %40 = vector.extract_strided_slice %23 {offsets = [1, 0], sizes = [1, 32], strides = [1, 1]} : vector<2x32xf32> to vector<1x32xf32>
    %41 = vector.broadcast %40 : vector<1x32xf32> to vector<2x32xf32>
    %42 = arith.mulf %31, %41 : vector<2x32xf32>
    %cst_26 = arith.constant dense<0.000000e+00> : vector<2xf32>
    %43 = vector.multi_reduction <add>, %42, %cst_26 [1] : vector<2x32xf32> to vector<2xf32>
    %44 = vector.shape_cast %43 : vector<2xf32> to vector<2x1xf32>
    %45 = vector.extract_strided_slice %24 {offsets = [0, 1], sizes = [1, 1], strides = [1, 1]} : vector<1x32xf32> to vector<1x1xf32>
    %46 = vector.broadcast %45 : vector<1x1xf32> to vector<2x1xf32>
    %47 = arith.addf %44, %46 : vector<2x1xf32>
    %48 = arith.maximumf %39, %47 : vector<2x1xf32>
    %49 = arith.subf %39, %48 : vector<2x1xf32>
    %50 = math.exp %49 : vector<2x1xf32>
    %51 = arith.subf %47, %48 : vector<2x1xf32>
    %52 = math.exp %51 : vector<2x1xf32>
    %53 = arith.addf %50, %52 : vector<2x1xf32>
    %54 = arith.divf %50, %53 : vector<2x1xf32>
    %55 = arith.divf %52, %53 : vector<2x1xf32>
    %56 = vector.shape_cast %5 : vector<128x32xf32> to vector<2x64x32xf32>
    %57 = vector.shape_cast %54 : vector<2x1xf32> to vector<2x1x1xf32>
    %58 = vector.broadcast %57 : vector<2x1x1xf32> to vector<2x64x32xf32>
    %59 = arith.mulf %58, %56 : vector<2x64x32xf32>
    %60 = vector.broadcast %55 : vector<2x1xf32> to vector<2x32xf32>
    %61 = arith.mulf %60, %6 : vector<2x32xf32>
    %62 = vector.shape_cast %61 : vector<2x32xf32> to vector<2x1x32xf32>
    %63 = vector.broadcast %62 : vector<2x1x32xf32> to vector<2x64x32xf32>
    %64 = arith.addf %59, %63 : vector<2x64x32xf32>
    %65 = vector.shape_cast %3 : vector<1x32xf32> to vector<1x1x32xf32>
    %66 = vector.broadcast %65 : vector<1x1x32xf32> to vector<2x64x32xf32>
    %67 = arith.addf %64, %66 : vector<2x64x32xf32>
    %c0_27 = arith.constant 0 : index
    %c0_28 = arith.constant 0 : index
    %c0_29 = arith.constant 0 : index
    %68 = vector.load %arg3[%c0_27, %c0_28, %c0_29] : memref<2x64x32xf32, #tpu.memory_space<vmem>>, vector<2x64x32xf32>
    tpu.vector_store %arg3[%c0_27, %c0_28, %c0_29], %67 {strides = array<i32>} : memref<2x64x32xf32, #tpu.memory_space<vmem>>, vector<2x64x32xf32>,
    return
  }
}

</mosaic_0001>

<bundles_post_ra>
// kernel: tpu_custom_call.1
= control target key start
LH: loop header
LB: loop body
LE: loop exit
PB: predicated region body
PF: predicated region fallthrough
CT: control target
= control target key end

     0   :  { %v876_v0 = vmov 0.0   ;;  %vm877_vm0 = vmmov 0   ;;  %vm36_vm1 = vcmask 261120   ;;  %vm365_vm2 = vcmask 1040384   ;;  %s878_s19 = smov 127   ;;  %s879_s20 = smov 1   ;;  %s1165_s2 = inlined_call_operand.vmem [shape: f32[128,32], index: 2, kind: input, shape index: {}]   ;;  %s1166_s0 = inlined_call_operand.vmem [shape: f32[2,64,32], index: 0, kind: input, shape index: {}]   ;;  %s1167_s1 = inlined_call_operand.vmem [shape: f32[2,32], index: 1, kind: input, shape index: {}]   ;;  %s1168_s3 = inlined_call_operand.vmem [shape: f32[2,64,32], index: 3, kind: output, shape index: {}]  }
   0x1   :  { %825 = vmatprep.subr.mxu1 %v876_v0  ;;  %v34_v1 = vld [vmem:[%s1165_s2 + $0x70] sm:$0xff]  ;;  %v33_v2 = vld [vmem:[%s1165_s2 + $0x68] sm:$0xff]  ;;  %833 = vmatprep.mubr.msk.f32.mxu1 %vm877_vm0, %v876_v0  ;;  %v32_v3 = vld [vmem:[%s1165_s2 + $0x60] sm:$0xff]  ;;  %vm532_vm3 = vcmask 254976  }
   0x2   :  { %826 = vmatpush3.msra.mxu1 %v34_v1  ;;  %793 = vmatprep.subr.mxu0 %v34_v1  ;;  %v31_v4 = vld [vmem:[%s1165_s2 + $0x58] sm:$0xff]  ;;  %v303_v5 = vld [vmem:[%s1166_s0] sm:$0xff]  ;;  %v304_v6 = vld [vmem:[%s1166_s0 + $0x8] sm:$0xff] }
   0x3   :  { %827 = vmatprep.subr.mxu1 %v876_v0  ;;  %794 = vmatpush3.msra.mxu0 %v34_v1  ;;  %v30_v7 = vld [vmem:[%s1167_s1] sm:$0x3]  ;;  %v305_v8 = vld [vmem:[%s1166_s0 + $0x10] sm:$0xff]  ;;  %v935_v9 = vld [vmem:[%s1166_s0 + $0x18] sm:$0xff]  ;;  %v311_v10 = vsel %vm36_vm1, %v303_v5, 0.0  ;;  %v312_v11 = vsel %vm36_vm1, %v304_v6, 0.0 }
   0x4   :  { %828 = vmatpush3.msra.mxu1 %v33_v2  ;;  %795 = vmatprep.subr.mxu0 %v33_v2  ;;  %v374_v12 = vld [vmem:[%s1165_s2 + $0x38] sm:$0xff]  ;;  %v946_v13 = vld [vmem:[%s1166_s0 + $0x20] sm:$0xff]  ;;  %v313_v14 = vadd.f32 %v312_v11, %v311_v10  ;;  %v314_v15 = vsel %vm36_vm1, %v305_v8, 0.0  ;;  %v316_v16 = vsel %vm36_vm1, %v935_v9, 0.0  ;;  %v959_v18 = vld [vmem:[%s1166_s0 + $0x48] sm:$0xff] }
   0x5   :  { %829 = vmatprep.subr.mxu1 %v876_v0  ;;  %796 = vmatpush3.msra.mxu0 %v33_v2  ;;  %v954_v17 = vld [vmem:[%s1166_s0 + $0x40] sm:$0xff]  ;;  %v964_v19 = vld [vmem:[%s1166_s0 + $0x50] sm:$0xff]  ;;  %v974_v21 = vld [vmem:[%s1166_s0 + $0x28] sm:$0xff]  ;;  %v344_v25 = vsel %vm36_vm1, %v959_v18, 0.0  ;;  %v318_v27 = vsel %vm36_vm1, %v946_v13, 0.0 }
   0x6   :  { %830 = vmatpush3.msra.mxu1 %v32_v3  ;;  %797 = vmatprep.subr.mxu0 %v32_v3  ;;  %v373_v20 = vld [vmem:[%s1165_s2 + $0x30] sm:$0xff]  ;;  %v315_v22 = vadd.f32 %v314_v15, %v313_v14  ;;  %v979_v23 = vld [vmem:[%s1166_s0 + $0x58] sm:$0xff]  ;;  %v343_v24 = vsel %vm36_vm1, %v954_v17, 0.0  ;;  %v346_v26 = vsel %vm36_vm1, %v964_v19, 0.0  ;;  %v994_v28 = vld [vmem:[%s1166_s0 + $0x60] sm:$0xff]  ;;  %v320_v34 = vsel %vm36_vm1, %v974_v21, 0.0 }
   0x7   :  { %831 = vmatprep.subr.mxu1 %v876_v0  ;;  %798 = vmatpush3.msra.mxu0 %v32_v3  ;;  %v345_v29 = vadd.f32 %v344_v25, %v343_v24  ;;  %v372_v30 = vld [vmem:[%s1165_s2 + $0x28] sm:$0xff]  ;;  %v309_v31 = vld [vmem:[%s1166_s0 + $0x30] sm:$0xff]  ;;  %v348_v33 = vsel %vm36_vm1, %v979_v23, 0.0  ;;  %v371_v37 = vld [vmem:[%s1165_s2 + $0x20] sm:$0xff]  ;;  %v350_v40 = vsel %vm36_vm1, %v994_v28, 0.0  ;;  %v527_v15 = vlaneseq }
   0x8   :  { %832 = vmatpush3.msra.mxu1 %v31_v4  ;;  %799 = vmatprep.subr.mxu0 %v31_v4  ;;  %v317_v32 = vadd.f32 %v316_v16, %v315_v22  ;;  %v1010_v35 = vld [vmem:[%s1166_s0 + $0x68] sm:$0xff]  ;;  %v310_v38 = vld [vmem:[%s1166_s0 + $0x38] sm:$0xff]  ;;  %v322_v41 = vsel %vm36_vm1, %v309_v31, 0.0  ;;  %v751_v42 = vld [vmem:[%s1166_s0 + $0x70] sm:$0xff] }
   0x9   :  { %834 = vmatmul.mubr.msk.f32.vlgmr.msra.gmra.mxu1 %vm36_vm1, %v30_v7  ;;  %836 = vmatprep.subr.mxu1 %v876_v0  ;;  %v347_v36 = vadd.f32 %v346_v26, %v345_v29  ;;  %v370_v44 = vld [vmem:[%s1165_s2 + $0x18] sm:$0xff]  ;;  %v352_v46 = vsel %vm36_vm1, %v1010_v35, 0.0  ;;  %v324_v47 = vsel %vm36_vm1, %v310_v38, 0.0  ;;  %v369_v50 = vld [vmem:[%s1165_s2 + $0x10] sm:$0xff]  ;;  %v354_v52 = vsel %vm36_vm1, %v751_v42, 0.0  ;;  %v368_v54 = vld [vmem:[%s1165_s2 + $0x8] sm:$0xff] }
   0xa   :  { %837 = vmatpush3.msra.mxu1 %v374_v12  ;;  %844 = vmatprep.mubr.msk.f32.mxu1 %vm877_vm0, %v876_v0  ;;  %v319_v39 = vadd.f32 %v318_v27, %v317_v32  ;;  %v752_v48 = vld [vmem:[%s1166_s0 + $0x78] sm:$0xff]  ;;  %v367_v58 = vld [vmem:[%s1165_s2] sm:$0xff]  ;;  %v528_v16 = vshrl.u32 %v527_v15, 7  ;;  %v756_v32 = vld [vmem:[%s1165_s2 + $0x50] ss:$0 sm:$0xff] }
   0xb   :  { %838 = vmatprep.subr.mxu1 %v876_v0  ;;  %800 = vmatpush3.msra.mxu0 %v31_v4  ;;  %v349_v43 = vadd.f32 %v348_v33, %v347_v36  ;;  %v356_v56 = vsel %vm36_vm1, %v752_v48, 0.0 }
   0xc   :  { %839 = vmatpush3.msra.mxu1 %v373_v20  ;;  %801 = vmatprep.mubr.msk.f32.mxu0 %vm36_vm1, %v303_v5  ;;  %v321_v45 = vadd.f32 %v320_v34, %v319_v39  ;;  %v376_v20 = vld [vmem:[%s1165_s2 + $0x48] sm:$0x3]  ;;  %v1087_v22 = vsub.s32 0, %v528_v16 }
   0xd   :  { %840 = vmatprep.subr.mxu1 %v876_v0  ;;  %802 = vmatmul.mubr.msk.f32.vlgmr.msra.gmra.mxu0 %vm36_vm1, %v304_v6  ;;  %v351_v49 = vadd.f32 %v350_v40, %v349_v43 }
   0xe   :  { %841 = vmatpush3.msra.mxu1 %v372_v30  ;;  %804 = vmatprep.mubr.msk.f32.mxu0 %vm36_vm1, %v305_v8  ;;  %v323_v51 = vadd.f32 %v322_v41, %v321_v45  ;;  %v530_v27 = vrot.slane %v376_v20, %v1087_v22  ;;  %v880_v45 = vmov 1  }
   0xf   :  { %842 = vmatprep.subr.mxu1 %v876_v0  ;;  %v353_v53 = vadd.f32 %v352_v46, %v351_v49  ;;  %865 = vset.pattern.permute.xlu1 %v880_v45 }
  0x10   :  { %843 = vmatpush3.msra.mxu1 %v371_v37  ;;  %v325_v55 = vadd.f32 %v324_v47, %v323_v51  ;;  %867 = vset.pattern.permute.xlu0 %v880_v45  ;;  %v881_v51 = vmov 1966171168  }
  0x11   :  { %845 = vmatmul.mubr.msk.f32.vlgmr.msra.gmra.mxu1 %vm36_vm1, %v30_v7  ;;  %847 = vmatprep.subr.mxu1 %v876_v0  ;;  %v355_v57 = vadd.f32 %v354_v52, %v353_v53  ;;  %v580_v52 = vunpack.c.l.s4 %v881_v51 }
  0x12   :  { %848 = vmatpush3.msra.mxu1 %v370_v44  ;;  %855 = vmatprep.mubr.msk.f32.mxu1 %vm877_vm0, %v876_v0  ;;  %v326_v59 = vrot.slane %v325_v55, 4 }
  0x13   :  { %849 = vmatprep.subr.mxu1 %v876_v0  ;;  %805 = vmatmul.mubr.msk.f32.gmra.mxu0 %vm36_vm1, %v935_v9  ;;  %v357_v60 = vadd.f32 %v356_v56, %v355_v57 }
  0x14   :  { %850 = vmatpush3.msra.mxu1 %v369_v50  ;;  %807 = vmatprep.mubr.msk.f32.mxu0 %vm36_vm1, %v946_v13  ;;  %v327_v61 = vadd.f32 %v326_v59, %v325_v55 }
  0x15   :  { %851 = vmatprep.subr.mxu1 %v876_v0  ;;  %v358_v62 = vrot.slane %v357_v60, 4 }
  0x16   :  { %852 = vmatpush3.msra.mxu1 %v368_v54  ;;  %v328_v63 = vrot.slane %v327_v61, 2  ;;  %v581_v54 = vunpack.c.0.s8 %v580_v52 }
  0x17   :  { %853 = vmatprep.subr.mxu1 %v876_v0  ;;  %808 = vmatmul.mubr.msk.f32.gmra.mxu0 %vm36_vm1, %v974_v21  ;;  %v359_v1 = vadd.f32 %v358_v62, %v357_v60 }
  0x18   :  { %854 = vmatpush3.msra.mxu1 %v367_v58  ;;  %810 = vmatprep.mubr.msk.f32.mxu0 %vm36_vm1, %v309_v31  ;;  %v329_v2 = vadd.f32 %v328_v63, %v327_v61  ;;  %v584_v55 = vsub.s32 %v581_v54, %v528_v16  ;;  %v882_v63 = vmov 0  }
  0x19   :  { %v360_v3 = vrot.slane %v359_v1, 2 }
  0x1a   :  { %v330_v4 = vrot.slane %v329_v2, 1 }
  0x1b   :  { %811 = vmatmul.mubr.msk.f32.gmra.mxu0 %vm36_vm1, %v310_v38  ;;  %v361_v5 = vadd.f32 %v360_v3, %v359_v1 }
  0x1c   :  { %813 = vmatprep.mubr.msk.f32.mxu0 %vm36_vm1, %v954_v17  ;;  %v331_v0 = vadd.f32 %v330_v4, %v329_v2  ;;  %v543_v17 = vsub.s32 1, %v528_v16 }
  0x1d   :  { %v362_v6 = vrot.slane %v361_v5, 1 }
  0x1e   :  { %v333_v7 = vmul.f32 0.015625, %v331_v0  ;;  %v544_v25 = vrot.slane %v376_v20, %v543_v17 }
  0x1f   :  { %814 = vmatmul.mubr.msk.f32.gmra.mxu0 %vm36_vm1, %v959_v18  ;;  %v363_v8 = vadd.f32 %v362_v6, %v361_v5  ;;  %v755_v18 = vld [vmem:[%s1165_s2 + $0x40] ss:$0 sm:$0xff] }
  0x20   :  { %816 = vmatprep.mubr.msk.f32.mxu0 %vm36_vm1, %v964_v19 }
  0x21   :  { %v364_v9 = vmul.f32 0.015625, %v363_v8 }
  0x23   :  { %817 = vmatmul.mubr.msk.f32.gmra.mxu0 %vm36_vm1, %v979_v23  ;;  %v366_v10 = vsel %vm365_vm2, %v333_v7, %v364_v9 }
  0x24   :  { %819 = vmatprep.mubr.msk.f32.mxu0 %vm36_vm1, %v994_v28  ;;  %856 = vmatmul.mubr.msk.f32.vlgmr.msra.gmra.mxu1 %vm36_vm1, %v366_v10 }
  0x27   :  { %820 = vmatmul.mubr.msk.f32.gmra.mxu0 %vm36_vm1, %v1010_v35 }
  0x28   :  { %822 = vmatprep.mubr.msk.f32.mxu0 %vm36_vm1, %v751_v42 }
  0x2b   :  { %823 = vmatmul.mubr.msk.f32.gmra.mxu0 %vm36_vm1, %v752_v48 }
  0xc9   :  { %v1079_v11 = vpop.f32.mrf.mxu1 }
  0xcb   :  { %v835_v12 = vpop.f32.mrf.mxu1 }
  0xcd   :  { %v803_v2 = vpop.f32.mrf.mxu0 }
  0xcf   :  { %v151_v3 = vpop.f32.mrf.mxu0 }
  0xd1   :  { %v444_v13 = vpop.f32.mrf.mxu1 }
  0xd3   :  { %v846_v14 = vpop.f32.mrf.mxu1  ;;  %v806_v4 = vpop.f32.mrf.mxu0 }
  0xd5   :  { %v161_v5 = vpop.f32.mrf.mxu0 }
  0xd7   :  { %v809_v0 = vpop.f32.mrf.mxu0 }
  0xd9   :  { %v171_v6 = vpop.f32.mrf.mxu0 }
  0xdb   :  { %v812_v7 = vpop.f32.mrf.mxu0 }
  0xdd   :  { %v181_v8 = vpop.f32.mrf.mxu0 }
  0xdf   :  { %v815_v9 = vpop.f32.mrf.mxu0 }
  0xe1   :  { %v191_v10 = vpop.f32.mrf.mxu0 }
  0xe3   :  { %v818_v12 = vpop.f32.mrf.mxu0 }
  0xe4   :  { %v517_v19 = vpop.f32.mrf.mxu1 }
  0xe5   :  { %v518_v21 = vadd.f32 %v517_v19, %v444_v13  ;;  %v201_v13 = vpop.f32.mrf.mxu0 }
  0xe6   :  { %v857_v23 = vpop.f32.mrf.mxu1 }
  0xe7   :  { %v525_v24 = vadd.f32 %v755_v18, %v518_v21  ;;  %v821_v16 = vpop.f32.mrf.mxu0 }
  0xe9   :  { %v526_v26 = vmax.f32 %v525_v24, 0.0  ;;  %v211_v20 = vpop.f32.mrf.mxu0 }
  0xeb   :  { %v545_v28 = vmul.f32 %v544_v25, %v526_v26  ;;  %v531_v30 = vmul.f32 %v530_v27, %v526_v26 }
  0xed   :  { %v546_v29 = vsel %vm532_vm3, %v545_v28, 0.0  ;;  %v533_v31 = vsel %vm532_vm3, %v531_v30, 0.0 }
  0xee   :  { %547 = vadd.xlane.f32.xlu0 %v546_v29 }
  0xf2   :  { %534 = vadd.xlane.f32.xlu0 %v533_v31  ;;  %v757_v31 = vld [vmem:[%s1165_s2 + $0x78] ss:$0 sm:$0xff] }
 0x177   :  { %v548_v33 = vpop.xlane.xlu0 %547 }
 0x178   :  { %v549_v34 = vadd.f32 %v756_v32, %v548_v33 }
 0x17a   :  { %551 = vrot.lane.b32.xlu1 %v549_v34, %s878_s19 }
 0x17b   :  { %v535_v35 = vpop.xlane.xlu0 %534 }
 0x17c   :  { %v540_v36 = vadd.f32 %v756_v32, %v535_v35 }
 0x1ec   :  { %v552_v37 = vpop.permute.xlu1 %551 }
 0x1ed   :  { %v554_v38 = vmax.f32 %v540_v36, %v552_v37  ;;  %v824_v37 = vpop.f32.mrf.mxu0 }
 0x1ef   :  { %v555_v39 = vsub.f32 %v540_v36, %v554_v38  ;;  %559 = vrot.lane.b32.xlu1 %v554_v38, %s879_s20 }
 0x1f1   :  { %v556_v44 = vmul.f32 1.442695, %v555_v39 }
 0x261   :  { %v560_v40 = vpop.permute.xlu1 %559 }
 0x262   :  { %v562_v41 = vsub.f32 %v549_v34, %v560_v40 }
 0x264   :  { %v563_v42 = vmul.f32 1.442695, %v562_v41 }
 0x266   :  { %868 = vpow2.f32 %v563_v42 }
 0x267   :  { %870 = vpow2.f32 %v556_v44 }
 0x273   :  { %v869_v43 = vpop.eup %868 }
 0x274   :  { %566 = vrot.lane.b32.xlu0 %v869_v43, %s878_s19  ;;  %v871_v46 = vpop.eup %870 }
 0x2e6   :  { %v567_v47 = vpop.permute.xlu0 %566 }
 0x2e7   :  { %v569_v48 = vadd.f32 %v871_v46, %v567_v47 }
 0x2e9   :  { %872 = vrcp.f32 %v569_v48  ;;  %573 = vrot.lane.b32.xlu1 %v569_v48, %s879_s20 }
 0x2f6   :  { %v873_v49 = vpop.eup %872 }
 0x2f7   :  { %v571_v50 = vmul.f32 %v873_v49, %v871_v46 }
 0x2f9   :  { %v585_v56 = vrot.slane %v571_v50, %v584_v55 }
 0x2fb   :  { %v593_v59 = vrot.slane %v585_v56, %v584_v55  ;;  %v586_v60 = vcombine.high %v585_v56, %v585_v56 }
 0x2fd   :  { %v604_v61 = vrot.slane %v593_v59, %v1087_v22  ;;  %v600_v62 = vrot.slane %v586_v60, %v584_v55 }
 0x2ff   :  { %v608_v1 = vrot.slane %v600_v62, %v1087_v22 }
 0x35b   :  { %v574_v53 = vpop.permute.xlu1 %573 }
 0x35c   :  { %874 = vrcp.f32 %v574_v53 }
 0x369   :  { %v875_v57 = vpop.eup %874 }
 0x36a   :  { %v577_v58 = vmul.f32 %v875_v57, %v869_v43 }
 0x36c   :  { %635 = vperm.xlu1 %865, %v577_v58  }
 0x370   :  { %866 = vset.pattern.permute.xlu1 %v882_v63 }
 0x371   :  { %610 = vperm.xlu1 %866, %v604_v61  }
 0x375   :  { %614 = vperm.xlu1 %866, %v608_v1  }
 0x3e7   :  { %v636_v14 = vpop.permute.xlu1 %635 }
 0x3e8   :  { %v638_v15 = vmul.f32 %v636_v14, %v1079_v11 }
 0x3ea   :  { %v646_v17 = vrot.slane %v638_v15, %v584_v55 }
 0x3ec   :  { %v647_v18 = vcombine.high %v646_v17, %v646_v17  ;;  %v654_v19 = vrot.slane %v646_v17, %v584_v55  ;;  %v611_v21 = vpop.permute.xlu1 %610 }
 0x3ed   :  { %v617_v23 = vmul.f32 %v611_v21, %v151_v3  ;;  %v618_v24 = vmul.f32 %v803_v2, %v611_v21  ;;  %v619_v25 = vmul.f32 %v611_v21, %v161_v5  ;;  %v620_v26 = vmul.f32 %v806_v4, %v611_v21 }
 0x3ee   :  { %v661_v27 = vrot.slane %v647_v18, %v584_v55  ;;  %v665_v28 = vrot.slane %v654_v19, %v1087_v22  ;;  %v621_v29 = vmul.f32 %v611_v21, %v171_v6  ;;  %v622_v30 = vmul.f32 %v809_v0, %v611_v21 }
 0x3ef   :  { %v623_v11 = vmul.f32 %v611_v21, %v181_v8  ;;  %v624_v32 = vmul.f32 %v812_v7, %v611_v21 }
 0x3f0   :  { %v669_v33 = vrot.slane %v661_v27, %v1087_v22  ;;  %v672_v34 = vadd.f32 %v665_v28, %v617_v23  ;;  %v673_v35 = vadd.f32 %v665_v28, %v618_v24  ;;  %v674_v36 = vadd.f32 %v665_v28, %v619_v25  ;;  %v615_v42 = vpop.permute.xlu1 %614  ;;  %v221_v22 = vpop.f32.mrf.mxu0 }
 0x3f1   :  { %v675_v38 = vadd.f32 %v665_v28, %v620_v26  ;;  %v676_v39 = vadd.f32 %v665_v28, %v621_v29  ;;  %v677_v40 = vadd.f32 %v665_v28, %v622_v30  ;;  %v678_v41 = vadd.f32 %v665_v28, %v623_v11 }
 0x3f2   :  { %v679_v43 = vadd.f32 %v665_v28, %v624_v32  ;;  %v692_v44 = vadd.f32 %v757_v31, %v672_v34  ;;  %v693_v45 = vadd.f32 %v757_v31, %v673_v35  ;;  %v694_v46 = vadd.f32 %v757_v31, %v674_v36 }
 0x3f3   :  { %v695_v47 = vadd.f32 %v757_v31, %v675_v38  ;;  %v696_v48 = vadd.f32 %v757_v31, %v676_v39  ;;  %v697_v49 = vadd.f32 %v757_v31, %v677_v40  ;;  %v698_v50 = vadd.f32 %v757_v31, %v678_v41 }
 0x3f4   :  { %v699_v51 = vadd.f32 %v757_v31, %v679_v43  ;;  %708 = vst.msk [vmem:[%s1168_s3] sm:$0xff] %vm36_vm1, %v692_v44  ;;  %709 = vst.msk [vmem:[%s1168_s3 + $0x8] sm:$0xff] %vm36_vm1, %v693_v45  ;;  %v625_v52 = vmul.f32 %v615_v42, %v191_v10  ;;  %v626_v53 = vmul.f32 %v815_v9, %v615_v42 }
 0x3f5   :  { %710 = vst.msk [vmem:[%s1168_s3 + $0x10] sm:$0xff] %vm36_vm1, %v694_v46  ;;  %v627_v54 = vmul.f32 %v615_v42, %v201_v13  ;;  %711 = vst.msk [vmem:[%s1168_s3 + $0x18] sm:$0xff] %vm36_vm1, %v695_v47  ;;  %v628_v55 = vmul.f32 %v818_v12, %v615_v42  ;;  %v629_v56 = vmul.f32 %v615_v42, %v211_v20 }
 0x3f6   :  { %712 = vst.msk [vmem:[%s1168_s3 + $0x20] sm:$0xff] %vm36_vm1, %v696_v48  ;;  %713 = vst.msk [vmem:[%s1168_s3 + $0x28] sm:$0xff] %vm36_vm1, %v697_v49  ;;  %v630_v57 = vmul.f32 %v821_v16, %v615_v42  ;;  %v631_v58 = vmul.f32 %v615_v42, %v221_v22  ;;  %v632_v59 = vmul.f32 %v824_v37, %v615_v42 }
 0x3f7   :  { %714 = vst.msk [vmem:[%s1168_s3 + $0x30] sm:$0xff] %vm36_vm1, %v698_v50  ;;  %715 = vst.msk [vmem:[%s1168_s3 + $0x38] sm:$0xff] %vm36_vm1, %v699_v51  ;;  %v680_v60 = vadd.f32 %v669_v33, %v625_v52  ;;  %v681_v61 = vadd.f32 %v669_v33, %v626_v53  ;;  %v682_v62 = vadd.f32 %v669_v33, %v627_v54 }
 0x3f8   :  { %v683_v63 = vadd.f32 %v669_v33, %v628_v55  ;;  %v684_v1 = vadd.f32 %v669_v33, %v629_v56  ;;  %v685_v2 = vadd.f32 %v669_v33, %v630_v57  ;;  %v686_v3 = vadd.f32 %v669_v33, %v631_v58 }
 0x3f9   :  { %v687_v4 = vadd.f32 %v669_v33, %v632_v59  ;;  %v700_v5 = vadd.f32 %v757_v31, %v680_v60  ;;  %v701_v0 = vadd.f32 %v757_v31, %v681_v61  ;;  %v702_v6 = vadd.f32 %v757_v31, %v682_v62 }
 0x3fa   :  { %v703_v7 = vadd.f32 %v757_v31, %v683_v63  ;;  %v704_v8 = vadd.f32 %v757_v31, %v684_v1  ;;  %v705_v9 = vadd.f32 %v757_v31, %v685_v2  ;;  %v706_v10 = vadd.f32 %v757_v31, %v686_v3 }
 0x3fb   :  { %v707_v12 = vadd.f32 %v757_v31, %v687_v4  ;;  %716 = vst.msk [vmem:[%s1168_s3 + $0x40] sm:$0xff] %vm36_vm1, %v700_v5  ;;  %717 = vst.msk [vmem:[%s1168_s3 + $0x48] sm:$0xff] %vm36_vm1, %v701_v0 }
 0x3fc   :  { %718 = vst.msk [vmem:[%s1168_s3 + $0x50] sm:$0xff] %vm36_vm1, %v702_v6  ;;  %719 = vst.msk [vmem:[%s1168_s3 + $0x58] sm:$0xff] %vm36_vm1, %v703_v7 }
 0x3fd   :  { %720 = vst.msk [vmem:[%s1168_s3 + $0x60] sm:$0xff] %vm36_vm1, %v704_v8  ;;  %721 = vst.msk [vmem:[%s1168_s3 + $0x68] sm:$0xff] %vm36_vm1, %v705_v9 }
 0x3fe   :  { %722 = vst.msk [vmem:[%s1168_s3 + $0x70] sm:$0xff] %vm36_vm1, %v706_v10  ;;  %723 = vst.msk [vmem:[%s1168_s3 + $0x78] sm:$0xff] %vm36_vm1, %v707_v12 }

</bundles_post_ra>
